<compile_context>
chip_gen: v7x
topology: tpu7x:2x2x1
jax: 0.10.0
libtpu: 0.0.40
codegen_flags: <defaults>
</compile_context>

<pallas_src>
import functools

import jax
import jax.numpy as jnp
from jax.experimental import pallas as pl
from jax.experimental.pallas import tpu as pltpu


def _round_up(x, m):
    return ((x + m - 1) // m) * m


def _focal_loss_tile_kernel(x_ref, t_ref, a_ref, out_ref, *, gamma, n_total):
    # x_ref: (TN, C) logits tile, t_ref: (TN, 1) int32 targets tile,
    # a_ref: (1, C) f32 per-class alpha table (broadcast block, same every step).
    # out_ref: (8, 128) f32 block holding this tile's partial loss sum
    #          (broadcast across the block so the store is unmasked/lane-dense).
    i = pl.program_id(0)
    x = x_ref[...].astype(jnp.float32)                 # upcast (bf16 inputs OK)
    t = t_ref[...]                                     # (TN, 1) int32
    alpha_row = a_ref[...]                             # (1, C) f32
    tn, c = x.shape

    # Valid-row mask: global row index < true batch size (handles padded tail).
    row_idx = jax.lax.broadcasted_iota(jnp.int32, (tn, 1), 0) + i * tn
    valid = row_idx < n_total                          # (TN, 1) bool

    # Numerically stable log-sum-exp over the class axis (lanes -> XLU reduce,
    # exp on the EUP).
    m = jnp.max(x, axis=-1, keepdims=True)             # (TN, 1)
    lse = m + jnp.log(jnp.sum(jnp.exp(x - m), axis=-1, keepdims=True))

    # Gather target-class logit and per-class alpha via a one-hot mask
    # (no dynamic gather on TPU; this is a VPU select + XLU lane reduce).
    class_idx = jax.lax.broadcasted_iota(jnp.int32, (tn, c), 1)
    onehot = class_idx == t                            # (TN, C) bool
    logit_t = jnp.sum(jnp.where(onehot, x, 0.0), axis=-1, keepdims=True)
    alpha_t = jnp.sum(jnp.where(onehot, alpha_row, 0.0), axis=-1, keepdims=True)

    # Cross-entropy per sample; clamp >= 0 so rounding can't make pt > 1.
    ce = jnp.maximum(lse - logit_t, 0.0)               # (TN, 1)
    pt = jnp.exp(-ce)
    one_minus_pt = 1.0 - pt

    # (1 - pt) ** gamma: explicit VPU multiplies for small integer gamma
    # (lax.pow would cost a log+exp on the single EUP and can NaN on a
    # slightly negative base).
    g = float(gamma)
    if g == int(g) and 0 <= int(g) <= 4:
        w = jnp.ones_like(one_minus_pt)
        for _ in range(int(g)):
            w = w * one_minus_pt
    else:
        w = jnp.power(one_minus_pt, g)                 # base >= 0 thanks to clamp

    f_loss = alpha_t * w * ce                          # (TN, 1)
    f_loss = jnp.where(valid, f_loss, 0.0)             # drop padded tail rows

    tile_sum = jnp.sum(f_loss)
    out_ref[...] = jnp.full(out_ref.shape, tile_sum, dtype=out_ref.dtype)


def focal_loss(logits, targets, alpha=1.0, gamma=2.0, reduction="mean",
               tile_n=None, vmem_limit_bytes=64 * 1024 * 1024):
    """logits: (N, C) float32/bfloat16; targets: (N,) int.

    alpha may be a scalar (as in the module's default) or a length-C
    list/tuple/array for per-class weighting. Returns a scalar f32 for
    reduction in {'mean', 'sum'}.
    """
    n, c = logits.shape
    targets_2d = targets.astype(jnp.int32).reshape(n, 1)

    # Per-class alpha table (1, C). Scalar alpha is broadcast across classes,
    # which is exactly alpha_t = alpha for every sample (module semantics).
    alpha_arr = jnp.asarray(alpha, dtype=jnp.float32).reshape(-1)
    if alpha_arr.size == 1:
        alpha_2d = jnp.full((1, c), alpha_arr[0], dtype=jnp.float32)
    elif alpha_arr.size == c:
        alpha_2d = alpha_arr.reshape(1, c)
    else:
        raise ValueError("alpha must be a scalar or have length == num classes")

    # Pick a batch tile size TN (multiple of 8) so a double-buffered logits
    # tile stays ~16 MiB of VMEM -> safe on v5e/v6e (128 MiB) and v7x (64 MiB),
    # while still hundreds of rows for realistic C (amortizes the ~0.35 us
    # per-grid-step overhead).
    if tile_n is None:
        itemsize = jnp.dtype(logits.dtype).itemsize
        tile_n = max(8, (8 * 1024 * 1024) // max(c * itemsize, 1))
        tile_n = min(tile_n, 1024, _round_up(n, 8))
    tile_n = max(8, (int(tile_n) // 8) * 8)

    num_tiles = pl.cdiv(n, tile_n)
    n_pad = num_tiles * tile_n
    if n_pad != n:
        logits = jnp.pad(logits, ((0, n_pad - n), (0, 0)))
        targets_2d = jnp.pad(targets_2d, ((0, n_pad - n), (0, 0)))

    kernel = functools.partial(
        _focal_loss_tile_kernel, gamma=float(gamma), n_total=n,
    )

    partials = pl.pallas_call(
        kernel,
        out_shape=jax.ShapeDtypeStruct((num_tiles * 8, 128), jnp.float32),
        grid_spec=pltpu.PrefetchScalarGridSpec(
            num_scalar_prefetch=0,
            grid=(num_tiles,),
            in_specs=[
                pl.BlockSpec((tile_n, c), lambda i: (i, 0)),   # logits tile
                pl.BlockSpec((tile_n, 1), lambda i: (i, 0)),   # targets tile
                pl.BlockSpec((1, c), lambda i: (0, 0)),        # alpha table
            ],
            out_specs=pl.BlockSpec((8, 128), lambda i: (i, 0)),
        ),
        compiler_params=pltpu.CompilerParams(
            dimension_semantics=("parallel",),   # independent per-tile partials
            vmem_limit_bytes=int(vmem_limit_bytes),
        ),
    )(logits, targets_2d, alpha_2d)

    total = jnp.sum(partials[::8, 0])            # one partial sum per tile
    if reduction == "mean":
        return total / jnp.float32(n)            # divide by TRUE batch size
    elif reduction == "sum":
        return total
    else:
        # TODO(synk): reduction='none' would return the per-sample (N,) losses
        # directly instead of partial sums; not implemented here.
        raise NotImplementedError("reduction must be 'mean' or 'sum'")


def focal_loss_ref(logits, targets, alpha=1.0, gamma=2.0):
    """Pure-JAX reference mirroring the PyTorch module (reduction='mean')."""
    x = logits.astype(jnp.float32)
    lse = jax.nn.logsumexp(x, axis=-1)
    logit_t = jnp.take_along_axis(x, targets[:, None], axis=-1)[:, 0]
    ce = lse - logit_t
    pt = jnp.exp(-ce)
    alpha_arr = jnp.asarray(alpha, dtype=jnp.float32).reshape(-1)
    alpha_t = alpha_arr[targets] if alpha_arr.size > 1 else alpha_arr[0]
    f_loss = alpha_t * (1.0 - pt) ** gamma * ce
    return jnp.mean(f_loss)


if __name__ == "__main__":
    key = jax.random.PRNGKey(0)
    k1, k2, k3, k4 = jax.random.split(key, 4)

    # Test 1: tiny shape (batch=8, classes=16), single tile, scalar alpha.
    N, C = 8, 16
    logits = jax.random.normal(k1, (N, C), dtype=jnp.float32)
    targets = jax.random.randint(k2, (N,), 0, C, dtype=jnp.int32)
    loss = focal_loss(logits, targets, alpha=1.0, gamma=2.0)
    jax.block_until_ready(loss)
    ref = focal_loss_ref(logits, targets, alpha=1.0, gamma=2.0)
    assert jnp.allclose(loss, ref, atol=1e-5, rtol=1e-5), (loss, ref)

    # Test 2: multiple grid tiles + padded tail rows (N not a multiple of TN).
    N2, C2 = 37, 50
    logits2 = jax.random.normal(k3, (N2, C2), dtype=jnp.float32)
    targets2 = jax.random.randint(k4, (N2,), 0, C2, dtype=jnp.int32)
    loss2 = focal_loss(logits2, targets2, alpha=1.0, gamma=2.0, tile_n=16)
    jax.block_until_ready(loss2)
    ref2 = focal_loss_ref(logits2, targets2, alpha=1.0, gamma=2.0)
    assert jnp.allclose(loss2, ref2, atol=1e-5, rtol=1e-5), (loss2, ref2)

    # Test 3: per-class alpha (list), same shapes as test 2.
    alpha_list = [0.25 + 0.01 * i for i in range(C2)]
    loss3 = focal_loss(logits2, targets2, alpha=alpha_list, gamma=2.0, tile_n=16)
    jax.block_until_ready(loss3)
    ref3 = focal_loss_ref(logits2, targets2, alpha=alpha_list, gamma=2.0)
    assert jnp.allclose(loss3, ref3, atol=1e-5, rtol=1e-5), (loss3, ref3)

    print("KERNEL_OK")
</pallas_src>

<mosaic_0001>
module attributes {stable_mosaic.version = 11 : i64} {
  func.func @_focal_loss_tile_kernel(%arg0: i32, %arg1: memref<8x16xf32, #tpu.memory_space<vmem>>, %arg2: memref<8x1xi32, #tpu.memory_space<vmem>>, %arg3: memref<1x16xf32, #tpu.memory_space<vmem>>, %arg4: memref<8x128xf32, #tpu.memory_space<vmem>>) attributes {dimension_semantics = [#tpu.dimension_semantics<parallel>], iteration_bounds = array<i64: 1>, scalar_prefetch = 0 : i64, scratch_operands = 0 : i64, tpu.core_type = #tpu.core_type<tc>, window_params = [{transform_indices = @transform_0, window_bounds = array<i64: 8, 16>}, {transform_indices = @transform_1, window_bounds = array<i64: 8, 1>}, {pipeline_mode = #tpu.pipeline_mode<synchronous>, transform_indices = @transform_2, window_bounds = array<i64: 1, 16>}, {transform_indices = @transform_3, window_bounds = array<i64: 8, 128>}]} {
    %c0 = arith.constant 0 : index
    %c0_0 = arith.constant 0 : index
    %0 = vector.load %arg1[%c0, %c0_0] : memref<8x16xf32, #tpu.memory_space<vmem>>, vector<8x16xf32>
    %c0_1 = arith.constant 0 : index
    %c0_2 = arith.constant 0 : index
    %1 = vector.load %arg2[%c0_1, %c0_2] : memref<8x1xi32, #tpu.memory_space<vmem>>, vector<8x1xi32>
    %c0_3 = arith.constant 0 : index
    %c0_4 = arith.constant 0 : index
    %2 = vector.load %arg3[%c0_3, %c0_4] : memref<1x16xf32, #tpu.memory_space<vmem>>, vector<1x16xf32>
    %3 = tpu.iota {dimensions = array<i32: 0>} : vector<8x1xi32>
    %c8_i32 = arith.constant 8 : i32
    %4 = arith.muli %arg0, %c8_i32 : i32
    %5 = vector.broadcast %4 : i32 to vector<8x1xi32>
    %6 = arith.addi %3, %5 : vector<8x1xi32>
    %c8_i32_5 = arith.constant 8 : i32
    %7 = vector.broadcast %c8_i32_5 : i32 to vector<8x1xi32>
    %8 = arith.cmpi slt, %6, %7 : vector<8x1xi32>
    %cst = arith.constant dense<0xFF800000> : vector<8xf32>
    %9 = vector.multi_reduction <maximumf>, %0, %cst [1] : vector<8x16xf32> to vector<8xf32>
    %10 = vector.shape_cast %9 : vector<8xf32> to vector<8x1xf32>
    %11 = vector.broadcast %10 : vector<8x1xf32> to vector<8x16xf32>
    %12 = arith.subf %0, %11 : vector<8x16xf32>
    %13 = math.exp %12 : vector<8x16xf32>
    %cst_6 = arith.constant dense<0.000000e+00> : vector<8xf32>
    %14 = vector.multi_reduction <add>, %13, %cst_6 [1] : vector<8x16xf32> to vector<8xf32>
    %15 = vector.shape_cast %14 : vector<8xf32> to vector<8x1xf32>
    %16 = math.log %15 : vector<8x1xf32>
    %17 = arith.addf %10, %16 : vector<8x1xf32>
    %18 = tpu.iota {dimensions = array<i32: 1>} : vector<8x16xi32>
    %19 = vector.broadcast %1 : vector<8x1xi32> to vector<8x16xi32>
    %20 = arith.cmpi eq, %18, %19 : vector<8x16xi32>
    %cst_7 = arith.constant 0.000000e+00 : f32
    %21 = vector.broadcast %cst_7 : f32 to vector<8x16xf32>
    %22 = arith.select %20, %0, %21 : vector<8x16xi1>, vector<8x16xf32>
    %cst_8 = arith.constant dense<0.000000e+00> : vector<8xf32>
    %23 = vector.multi_reduction <add>, %22, %cst_8 [1] : vector<8x16xf32> to vector<8xf32>
    %24 = vector.shape_cast %23 : vector<8xf32> to vector<8x1xf32>
    %cst_9 = arith.constant 0.000000e+00 : f32
    %25 = vector.shape_cast %2 : vector<1x16xf32> to vector<1x16xf32>
    %26 = vector.broadcast %25 : vector<1x16xf32> to vector<8x16xf32>
    %27 = vector.broadcast %cst_9 : f32 to vector<8x16xf32>
    %28 = arith.select %20, %26, %27 : vector<8x16xi1>, vector<8x16xf32>
    %cst_10 = arith.constant dense<0.000000e+00> : vector<8xf32>
    %29 = vector.multi_reduction <add>, %28, %cst_10 [1] : vector<8x16xf32> to vector<8xf32>
    %30 = vector.shape_cast %29 : vector<8xf32> to vector<8x1xf32>
    %31 = arith.subf %17, %24 : vector<8x1xf32>
    %cst_11 = arith.constant 0.000000e+00 : f32
    %32 = vector.broadcast %cst_11 : f32 to vector<8x1xf32>
    %33 = arith.maximumf %31, %32 : vector<8x1xf32>
    %cst_12 = arith.constant 0.000000e+00 : f32
    %34 = vector.broadcast %cst_12 : f32 to vector<8x1xf32>
    %35 = arith.subf %34, %33 : vector<8x1xf32>
    %36 = math.exp %35 : vector<8x1xf32>
    %cst_13 = arith.constant 1.000000e+00 : f32
    %37 = vector.broadcast %cst_13 : f32 to vector<8x1xf32>
    %38 = arith.subf %37, %36 : vector<8x1xf32>
    %cst_14 = arith.constant 1.000000e+00 : f32
    %39 = vector.broadcast %cst_14 : f32 to vector<8x1xf32>
    %40 = arith.mulf %39, %38 : vector<8x1xf32>
    %41 = arith.mulf %40, %38 : vector<8x1xf32>
    %42 = arith.mulf %30, %41 : vector<8x1xf32>
    %43 = arith.mulf %42, %33 : vector<8x1xf32>
    %cst_15 = arith.constant 0.000000e+00 : f32
    %44 = vector.broadcast %cst_15 : f32 to vector<8x1xf32>
    %45 = arith.select %8, %43, %44 : vector<8x1xi1>, vector<8x1xf32>
    %46 = vector.shape_cast %45 : vector<8x1xf32> to vector<1x8x1xf32>
    %cst_16 = arith.constant dense<0.000000e+00> : vector<1xf32>
    %47 = vector.multi_reduction <add>, %46, %cst_16 [1, 2] : vector<1x8x1xf32> to vector<1xf32>
    %48 = vector.shape_cast %47 : vector<1xf32> to vector<1x1x1xf32>
    %49 = vector.extract %48[0, 0, 0] : f32 from vector<1x1x1xf32>
    %50 = vector.broadcast %49 : f32 to vector<8x128xf32>
    %c0_17 = arith.constant 0 : index
    %c0_18 = arith.constant 0 : index
    %51 = vector.load %arg4[%c0_17, %c0_18] : memref<8x128xf32, #tpu.memory_space<vmem>>, vector<8x128xf32>
    tpu.vector_store %arg4[%c0_17, %c0_18], %50 {strides = array<i32>} : memref<8x128xf32, #tpu.memory_space<vmem>>, vector<8x128xf32>,
    return
  }
  func.func @transform_0(%arg0: i32) -> (i32, i32) {
    %c0_i32 = arith.constant 0 : i32
    %c0_i32_0 = arith.constant 0 : i32
    return %arg0, %c0_i32 : i32, i32
  }
  func.func @transform_1(%arg0: i32) -> (i32, i32) {
    %c0_i32 = arith.constant 0 : i32
    %c0_i32_0 = arith.constant 0 : i32
    return %arg0, %c0_i32 : i32, i32
  }
  func.func @transform_2(%arg0: i32) -> (i32, i32) {
    %c0_i32 = arith.constant 0 : i32
    %c0_i32_0 = arith.constant 0 : i32
    %c0_i32_1 = arith.constant 0 : i32
    return %c0_i32, %c0_i32_0 : i32, i32
  }
  func.func @transform_3(%arg0: i32) -> (i32, i32) {
    %c0_i32 = arith.constant 0 : i32
    %c0_i32_0 = arith.constant 0 : i32
    return %arg0, %c0_i32 : i32, i32
  }
}

</mosaic_0001>

<bundles_post_ra>
// kernel: tpu_custom_call.1
= control target key start
LH: loop header
LB: loop body
LE: loop exit
PB: predicated region body
PF: predicated region fallthrough
CT: control target
= control target key end

     0   :  { %8 = vsyncpa [#allocation3], 0  ;;  %s317_s0 = inlined_call_operand.hbm [shape: f32[8,16], index: 0, kind: input, shape index: {}]   ;;  %s318_s1 = inlined_call_operand.hbm [shape: s32[8,1], index: 1, kind: input, shape index: {}]   ;;  %s319_s2 = inlined_call_operand.hbm [shape: f32[1,16], index: 2, kind: input, shape index: {}]   ;;  %s320_s3 = inlined_call_operand.hbm [shape: f32[8,128], index: 3, kind: output, shape index: {}]  }
   0x1   :  { %9 = vsyncpa [#allocation6], 0 }
   0x2   :  { %10 = vsyncpa [#allocation4], 0  ;;  %s240_s12 = smov [#allocation5]   ;;  %s241_s14 = smov [#allocation2]  }
   0x3   :  { %s27_s13 = sshll.u32 %s240_s12, 4  ;;  %s17_s15 = sshll.u32 %s241_s14, 4  ;;  %s28_s13 = int_to_ptr.vmem [resolvable:$true] %s27_s13  ;;  %s18_s15 = int_to_ptr.vmem [resolvable:$true] %s17_s15 }
   0x4   :  { %s146_s18 = scalar_lea.hbm %s318_s1, 128 }
   0x5   :  { %p147_p0 = scmp.ne.s32.totalorder %s318_s1, %s146_s18  ;;  %p150_p1 = scmp.lt.u32.totalorder %s146_s18, %s318_s1 }
   0x7   :  { %p152_p2 = pnand %p150_p1, %p147_p0 }
   0x9   :  { %155 = shalt.err (!%p152_p2)
}
   0xa   :  { %s156_s23 = scalar_lea.vmem %s28_s13, 128  ;;  %p161_p4 = scmp.lt.s32.totalorder %s28_s13, %s28_s13 }
   0xb   :  { %p157_p3 = scmp.ne.s32.totalorder %s28_s13, %s156_s23  ;;  %p162_p5 = scmp.lt.s32.totalorder %s156_s23, %s156_s23 }
   0xd   :  { %p163_p6 = por %p162_p5, %p161_p4 }
   0xf   :  { %p164_p7 = pnand %p163_p6, %p157_p3 }
  0x11   :  { %167 = shalt.err (!%p164_p7)
}
  0x12   :  { %30 = dma.hbm_to_vmem [thread:$0]  %s318_s1, 128, %s28_s13, [#allocation6]  }
  0x13   :  { %s168_s28 = scalar_lea.hbm %s317_s0, 128 }
  0x14   :  { %p169_p8 = scmp.ne.s32.totalorder %s317_s0, %s168_s28  ;;  %p172_p9 = scmp.lt.u32.totalorder %s168_s28, %s317_s0 }
  0x16   :  { %p174_p10 = pnand %p172_p9, %p169_p8 }
  0x18   :  { %177 = shalt.err (!%p174_p10)
}
  0x19   :  { %s178_s6 = scalar_lea.vmem %s18_s15, 128  ;;  %p183_p12 = scmp.lt.s32.totalorder %s18_s15, %s18_s15 }
  0x1a   :  { %p179_p11 = scmp.ne.s32.totalorder %s18_s15, %s178_s6  ;;  %p184_p13 = scmp.lt.s32.totalorder %s178_s6, %s178_s6 }
  0x1c   :  { %p185_p0 = por %p184_p13, %p183_p12 }
  0x1e   :  { %p186_p1 = pnand %p185_p0, %p179_p11 }
  0x20   :  { %189 = shalt.err (!%p186_p1)
}
  0x21   :  { %20 = dma.hbm_to_vmem [thread:$0]  %s317_s0, 128, %s18_s15, [#allocation3]  }
  0x22   :  { %s242_s8 = smov [#allocation7]   ;;  %s190_s12 = scalar_lea.hbm %s319_s2, 16 }
  0x23   :  { %s37_s9 = sshll.u32 %s242_s8, 4  ;;  %p191_p2 = scmp.ne.s32.totalorder %s319_s2, %s190_s12  ;;  %s38_s9 = int_to_ptr.vmem [resolvable:$true] %s37_s9 }
  0x24   :  { %p194_p3 = scmp.lt.u32.totalorder %s190_s12, %s319_s2 }
  0x26   :  { %p196_p4 = pnand %p194_p3, %p191_p2 }
  0x28   :  { %199 = shalt.err (!%p196_p4)
}
  0x29   :  { %s200_s18 = scalar_lea.vmem %s38_s9, 16  ;;  %s204_s0 = scalar_lea.vmem %s38_s9, 32 }
  0x2a   :  { %p201_p5 = scmp.ne.s32.totalorder %s38_s9, %s200_s18  ;;  %p205_p6 = scmp.lt.s32.totalorder %s38_s9, %s38_s9 }
  0x2b   :  { %p206_p7 = scmp.lt.s32.totalorder %s204_s0, %s200_s18 }
  0x2d   :  { %p207_p8 = por %p206_p7, %p205_p6 }
  0x2f   :  { %p208_p9 = pnand %p207_p8, %p201_p5 }
  0x31   :  { %211 = shalt.err (!%p208_p9)
}
  0x32   :  { %40 = dma.hbm_to_vmem [thread:$0]  %s319_s2, 16, %s38_s9, [#allocation6]  }
  0x33   :  { %234 = dma.done.wait [#allocation3], 128  }
  0x34   :  { %235 = vsyncadd [#allocation3], 4294967168 }
  0x35   :  { %236 = dma.done.wait [#allocation6], 144  }
  0x36   :  { %237 = vsyncadd [#allocation6], 4294967152  ;;  %v243_v0 = vmov 0   ;;  %vm59_vm0 = vcmask 130048   ;;  %v50_v1 = vld [vmem:[#allocation2] sm:$0xff]  ;;  %v51_v3 = vld [vmem:[#allocation5] sm:$0xff]  ;;  %v72_v7 = vlaneseq }
  0x37   :  { %139 = vset.pattern.permute.xlu0 %v243_v0  ;;  %v60_v2 = vsel %vm59_vm0, %v50_v1, -inf  ;;  %v131_v13 = vld [vmem:[#allocation7] ss:$0 sm:$0xff]  ;;  %vm102_vm2 = vcmask 7168   ;;  %s244_s2 = smov [#allocation8]  }
  0x38   :  { %61 = vmax.xlane.f32.xlu0 %v60_v2  ;;  %v73_v8 = vand.u32 127, %v72_v7  ;;  %s121_s20 = sshll.u32 %s244_s2, 4  ;;  %s122_s20 = int_to_ptr.vmem [resolvable:$true] %s121_s20 }
  0x39   :  { %s212_s22 = scalar_lea.vmem %s122_s20, 128  ;;  %p217_p11 = scmp.lt.s32.totalorder %s122_s20, %s122_s20 }
  0x3a   :  { %p213_p10 = scmp.ne.s32.totalorder %s122_s20, %s212_s22  ;;  %p218_p12 = scmp.lt.s32.totalorder %s212_s22, %s212_s22 }
  0x3c   :  { %p219_p13 = por %p218_p12, %p217_p11 }
  0x3e   :  { %p220_p0 = pnand %p219_p13, %p213_p10 }
  0x4e   :  { %75 = vperm.xlu0 %139, %v51_v3  }
  0xc5   :  { %v62_v4 = vpop.xlane.xlu0 %61 }
  0xc6   :  { %v63_v5 = vsub.f32 %v50_v1, %v62_v4 }
  0xc8   :  { %v64_v6 = vmul.f32 1.442695, %v63_v5 }
  0xca   :  { %140 = vpow2.f32 %v64_v6 }
  0xcd   :  { %v76_v9 = vpop.permute.xlu0 %75 }
  0xce   :  { %vm77_vm1 = vcmp.eq.s32.totalorder %v73_v8, %v76_v9 }
  0xcf   :  { %v78_v11 = vsel %vm77_vm1, %v50_v1, 0.0  ;;  %v88_v15 = vsel %vm77_vm1, %v131_v13, 0.0 }
  0xd0   :  { %v79_v14 = vsel %vm59_vm0, %v78_v11, 0.0  ;;  %v89_v16 = vsel %vm59_vm0, %v88_v15, 0.0 }
  0xd4   :  { %v141_v10 = vpop.eup %140 }
  0xd5   :  { %v66_v12 = vsel %vm59_vm0, %v141_v10, 0.0 }
  0xd6   :  { %67 = vadd.xlane.f32.xlu1 %v66_v12 }
  0xda   :  { %80 = vadd.xlane.f32.xlu1 %v79_v14 }
  0xde   :  { %90 = vadd.xlane.f32.xlu1 %v89_v16 }
 0x163   :  { %v68_v17 = vpop.xlane.xlu1 %67 }
 0x164   :  { %142 = vlog2.f32 %v68_v17 }
 0x167   :  { %v81_v21 = vpop.xlane.xlu1 %80 }
 0x16b   :  { %v91_v29 = vpop.xlane.xlu1 %90 }
 0x16e   :  { %v143_v18 = vpop.eup %142 }
 0x16f   :  { %v70_v19 = vmul.f32 0.6931472, %v143_v18 }
 0x171   :  { %v71_v20 = vadd.f32 %v70_v19, %v62_v4 }
 0x173   :  { %v92_v22 = vsub.f32 %v71_v20, %v81_v21 }
 0x175   :  { %v93_v23 = vmax.f32 %v92_v22, 0.0 }
 0x177   :  { %v94_v24 = vsub.f32 0.0, %v93_v23 }
 0x179   :  { %v95_v25 = vmul.f32 1.442695, %v94_v24 }
 0x17b   :  { %144 = vpow2.f32 %v95_v25 }
 0x185   :  { %v145_v26 = vpop.eup %144 }
 0x186   :  { %v97_v27 = vsub.f32 1.0, %v145_v26 }
 0x188   :  { %v98_v28 = vmul.f32 %v97_v27, %v97_v27 }
 0x18a   :  { %v99_v30 = vmul.f32 %v98_v28, %v91_v29 }
 0x18c   :  { %v100_v31 = vmul.f32 %v99_v30, %v93_v23 }
 0x18e   :  { %v103_v32 = vsel %vm102_vm2, %v100_v31, 0.0 }
 0x18f   :  { %104 = vadd.xlane.f32.xlu1 %v103_v32 }
 0x21c   :  { %v105_v33 = vpop.xlane.xlu1 %104 }
 0x21d   :  { %v106_v34 = vrot.slane %v105_v33, 4 }
 0x21f   :  { %v107_v35 = vadd.f32 %v106_v34, %v105_v33 }
 0x221   :  { %v108_v36 = vrot.slane %v107_v35, 2 }
 0x223   :  { %v109_v37 = vadd.f32 %v108_v36, %v107_v35 }
 0x225   :  { %v110_v38 = vrot.slane %v109_v37, 1 }
 0x227   :  { %v111_v39 = vadd.f32 %v110_v38, %v109_v37 }
 0x229   :  { %132 = vpush %v111_v39 }
 0x25a   :  { %s133_s21 = spop %132 }
 0x25b   :  { %v113_v40 = vstv %s133_s21 }
 0x25c   :  { %114 = vst [vmem:[#allocation8] sm:$0xff] %v113_v40 }
 0x25d   :  { %223 = shalt.err (!%p220_p0)
}
 0x25e   :  { %s224_s25 = scalar_lea.hbm %s320_s3, 128 }
 0x25f   :  { %p225_p1 = scmp.ne.s32.totalorder %s320_s3, %s224_s25  ;;  %p228_p2 = scmp.lt.u32.totalorder %s224_s25, %s320_s3 }
 0x261   :  { %p230_p3 = pnand %p228_p2, %p225_p1 }
 0x263   :  { %233 = shalt.err (!%p230_p3)
}
 0x264   :  { %124 = dma.vmem_to_hbm [thread:$0]  %s122_s20, 128, %s320_s3, [#allocation4]  }
 0x265   :  { %238 = dma.done.wait [#allocation4], 128  }
 0x266   :  { %239 = vsyncadd [#allocation4], 4294967168 }
 0x267   :  { %128 = vsyncpa [#allocation3], 1 }
 0x268   :  { %129 = vsyncpa [#allocation6], 1 }
 0x269   :  { %130 = vsyncpa [#allocation4], 1 }

</bundles_post_ra>
